<compile_context>
chip_gen: v5e
topology: v5e:2x2
jax: 0.10.0
libtpu: 0.0.40
codegen_flags: <defaults>
</compile_context>

<pallas_src>
import math

import jax
import jax.numpy as jnp
from jax.experimental import pallas as pl
from jax.experimental.pallas import tpu as pltpu


# ----------------------------------------------------------------------------
# Kernel
# ----------------------------------------------------------------------------
def head_kernel(x_ref, w_ref, b_ref, o_ref):
    """One grid step.

    x_ref: (B_t, C_in, tile_hw)   w_ref: (C_out, C_in)   b_ref: (C_out, 1)
    o_ref: (B_t, C_out, tile_hw)
    For each of the B_t images: (C_out,C_in) @ (C_in,tile_hw) + bias.
    """
    w = w_ref[...]
    bias = b_ref[...]
    for i in range(x_ref.shape[0]):          # B_t is small & static -> unrolled
        acc = jnp.dot(w, x_ref[i], preferred_element_type=jnp.float32)
        o_ref[i] = (acc + bias).astype(o_ref.dtype)


# ----------------------------------------------------------------------------
# Tiling heuristics
# ----------------------------------------------------------------------------
def _divisors(n):
    out = set()
    d = 1
    while d * d <= n:
        if n % d == 0:
            out.add(d)
            out.add(n // d)
        d += 1
    return sorted(out)


def _choose_tile_hw(HW, N, C_in, C_out, budget_bytes):
    """Pick the spatial (lane) tile width.  Returns (tile_hw, needs_pad).

    Preference order:
      1. whole feature map per block (no padding, no extra HBM pass),
      2. the largest 128-multiple divisor of HW under the VMEM budget,
      3. padded 128-multiple tiles (pathological HW only).
    """
    per_lane_bytes = 2 * (C_in + C_out) * 4        # double-buffered x+out, f32
    cap = max(128, budget_bytes // per_lane_bytes)
    # Megacore: with a single image make sure we expose >= 2 spatial blocks.
    if N == 1 and HW >= 256 and HW % 128 == 0:
        cap = min(cap, HW // 2)
    if HW <= cap:
        return HW, False
    lane_divs = [t for t in _divisors(HW) if t <= cap and t % 128 == 0]
    if lane_divs:
        return max(lane_divs), False
    # Pathological HW (no usable 128-multiple divisor): pad the ragged tail.
    return max(128, (cap // 128) * 128), True


def _choose_batch_block(N, HW, C_in, C_out, budget_bytes, target_lanes):
    """How many images to fuse per grid step (small feature maps only)."""
    per_img_bytes = 2 * (C_in + C_out) * HW * 4
    best = 1
    for bt in _divisors(N):
        if N > 1 and N // bt < 2:                  # keep >= 2 grid steps (megacore)
            break
        if bt * per_img_bytes > budget_bytes:
            break
        best = bt
        if bt * HW >= target_lanes:
            break
    return best


# ----------------------------------------------------------------------------
# Forward
# ----------------------------------------------------------------------------
def head_forward(x_nchw, w_cat, b_cat, *,
                 vmem_tile_budget=24 * 1024 * 1024, target_lanes=2048):
    """Fused Head forward in native NCHW layout.

    x_nchw: (N, C_in, H, W) float32
    w_cat : (C_out, C_in)   float32  (concatenated 1x1 conv weights)
    b_cat : (C_out,)        float32  (concatenated biases)
    returns (N, C_out, H, W) float32
    """
    N, C_in, H, W = x_nchw.shape
    C_out = w_cat.shape[0]
    HW = H * W

    # Contiguous NCHW -> (N, C_in, H*W): pure metadata reshape (no HBM copy).
    x3 = x_nchw.reshape(N, C_in, HW)

    tile_hw, needs_pad = _choose_tile_hw(HW, N, C_in, C_out, vmem_tile_budget)

    if needs_pad:
        # Rare fallback: costs one extra HBM pass for pad + final slice.
        HW_eff = pl.cdiv(HW, tile_hw) * tile_hw
        x3 = jnp.pad(x3, ((0, 0), (0, 0), (0, HW_eff - HW)))
        B_t = 1
    else:
        HW_eff = HW
        B_t = 1
        if tile_hw == HW:
            # Small maps: fuse several images per grid step to amortize the
            # per-step overhead (keeps >= 2 grid steps for megacore).
            B_t = _choose_batch_block(N, HW, C_in, C_out,
                                      vmem_tile_budget, target_lanes)

    b_2d = b_cat.reshape(C_out, 1)
    grid = (N // B_t, HW_eff // tile_hw)

    cost = pl.CostEstimate(
        flops=2 * N * HW_eff * C_in * C_out,
        transcendentals=0,
        bytes_accessed=4 * (x3.size + w_cat.size + b_2d.size + N * C_out * HW_eff),
    )

    out3 = pl.pallas_call(
        head_kernel,
        out_shape=jax.ShapeDtypeStruct((N, C_out, HW_eff), jnp.float32),
        grid_spec=pltpu.PrefetchScalarGridSpec(
            num_scalar_prefetch=0,
            grid=grid,
            in_specs=[
                # x tile: (B_t, C_in, tile_hw)
                pl.BlockSpec((B_t, C_in, tile_hw), lambda n, j: (n, 0, j)),
                # full fused weight matrix, resident across the grid
                pl.BlockSpec((C_out, C_in), lambda n, j: (0, 0)),
                # full fused bias
                pl.BlockSpec((C_out, 1), lambda n, j: (0, 0)),
            ],
            out_specs=pl.BlockSpec((B_t, C_out, tile_hw), lambda n, j: (n, 0, j)),
        ),
        compiler_params=pltpu.CompilerParams(
            dimension_semantics=("parallel", "parallel"),
            # Explicit limit so large tiles are legal on v5e (16 MiB default
            # scoped VMEM) and safely under v7x's 64 MiB physical VMEM.
            vmem_limit_bytes=32 * 1024 * 1024,
        ),
        cost_estimate=cost,
    )(x3, w_cat, b_2d)

    if HW_eff != HW:
        out3 = out3[:, :, :HW]
    # (N, C_out, H*W) -> (N, C_out, H, W): free metadata reshape.
    return out3.reshape(N, C_out, H, W)


# ----------------------------------------------------------------------------
# Parameter construction (matches the PyTorch __init__ bias adjustments)
# ----------------------------------------------------------------------------
def build_head_params(key, in_ch, num_anchors, num_classes, cls_probs=None):
    """Build the four 1x1 conv weights/biases and fuse them.

    Matches the PyTorch __init__ bias adjustments:
      - conv_cls bias += log(0.6 / (num_classes - 0.99))   (cls_probs is None)
      - conv_loc bias += -5.0
    Concatenation order (torch.cat along channel dim): box, obj, loc, cls.
    Returns w_cat: (C_out, C_in), b_cat: (C_out,).
    """
    def conv_init(k, out_ch):
        kw, kb = jax.random.split(k)
        bound = 1.0 / math.sqrt(in_ch)          # PyTorch Conv2d default init
        w = jax.random.uniform(kw, (out_ch, in_ch), jnp.float32, -bound, bound)
        b = jax.random.uniform(kb, (out_ch,), jnp.float32, -bound, bound)
        return w, b

    k_box, k_obj, k_loc, k_cls = jax.random.split(key, 4)
    w_box, b_box = conv_init(k_box, num_anchors * 4)
    w_obj, b_obj = conv_init(k_obj, num_anchors)
    w_loc, b_loc = conv_init(k_loc, num_anchors)
    w_cls, b_cls = conv_init(k_cls, num_anchors * num_classes)

    if cls_probs is None:
        b_cls = b_cls + math.log(0.6 / (num_classes - 0.99))
    else:
        cf = jnp.asarray(cls_probs, jnp.float32)
        shift = jnp.log(cf / cf.sum())
        b_cls = (b_cls.reshape(num_anchors, num_classes) + shift).reshape(-1)
    b_loc = b_loc + (-5.0)

    w_cat = jnp.concatenate([w_box, w_obj, w_loc, w_cls], axis=0)  # (C_out, C_in)
    b_cat = jnp.concatenate([b_box, b_obj, b_loc, b_cls], axis=0)  # (C_out,)
    return w_cat, b_cat


def head_reference(x_nchw, w_cat, b_cat):
    """Pure-JAX reference (same math as the four 1x1 convs + channel concat)."""
    return jnp.einsum("oc,nchw->nohw", w_cat, x_nchw) + b_cat[None, :, None, None]


if __name__ == "__main__":
    num_classes = 20
    anchor = [[(10, 13), (16, 30), (33, 23)]]     # -> num_anchors = 3
    num_anchors = len(anchor[0])
    in_ch = 32
    expected_cout = num_anchors * (4 + 1 + 1 + num_classes)   # 78

    key = jax.random.PRNGKey(0)
    k_p, k1, k2, k3 = jax.random.split(key, 4)
    w_cat, b_cat = build_head_params(k_p, in_ch, num_anchors, num_classes, None)

    configs = [
        (k1, (2, in_ch, 16, 16)),     # whole-map blocks, grid (2, 1)
        (k2, (8, in_ch, 13, 13)),     # tiny YOLO map -> batch-blocked (B_t=4)
        (k3, (1, in_ch, 176, 176)),   # single image -> >=2 spatial tiles (megacore)
    ]

    for k_x, shape in configs:
        x = jax.random.normal(k_x, shape, jnp.float32)
        out = jax.block_until_ready(head_forward(x, w_cat, b_cat))
        assert out.shape == (shape[0], expected_cout, shape[2], shape[3]), out.shape
        ref = head_reference(x, w_cat, b_cat)
        assert jnp.allclose(out, ref, atol=1e-4, rtol=1e-4), f"mismatch for {shape}"

    print("KERNEL_OK")
</pallas_src>

<mosaic_0001>
module attributes {stable_mosaic.version = 11 : i64} {
  func.func @head_kernel(%arg0: i32, %arg1: i32, %arg2: memref<1x32x256xf32, #tpu.memory_space<vmem>>, %arg3: memref<78x32xf32, #tpu.memory_space<vmem>>, %arg4: memref<78x1xf32, #tpu.memory_space<vmem>>, %arg5: memref<1x78x256xf32, #tpu.memory_space<vmem>>) attributes {dimension_semantics = [#tpu.dimension_semantics<parallel>, #tpu.dimension_semantics<parallel>], iteration_bounds = array<i64: 2, 1>, scalar_prefetch = 0 : i64, scratch_operands = 0 : i64, tpu.core_type = #tpu.core_type<tc>, window_params = [{transform_indices = @transform_0, window_bounds = array<i64: 1, 32, 256>}, {pipeline_mode = #tpu.pipeline_mode<synchronous>, transform_indices = @transform_1, window_bounds = array<i64: 78, 32>}, {pipeline_mode = #tpu.pipeline_mode<synchronous>, transform_indices = @transform_2, window_bounds = array<i64: 78, 1>}, {transform_indices = @transform_3, window_bounds = array<i64: 1, 78, 256>}]} {
    %c0 = arith.constant 0 : index
    %c0_0 = arith.constant 0 : index
    %0 = vector.load %arg3[%c0, %c0_0] : memref<78x32xf32, #tpu.memory_space<vmem>>, vector<78x32xf32>
    %c0_1 = arith.constant 0 : index
    %c0_2 = arith.constant 0 : index
    %1 = vector.load %arg4[%c0_1, %c0_2] : memref<78x1xf32, #tpu.memory_space<vmem>>, vector<78x1xf32>
    %c0_3 = arith.constant 0 : index
    %c0_4 = arith.constant 0 : index
    %c0_5 = arith.constant 0 : index
    %2 = vector.load %arg2[%c0_3, %c0_4, %c0_5] : memref<1x32x256xf32, #tpu.memory_space<vmem>>, vector<1x32x256xf32>
    %3 = vector.shape_cast %2 : vector<1x32x256xf32> to vector<32x256xf32>
    %cst = arith.constant dense<0.000000e+00> : vector<78x256xf32>
    %4 = tpu.matmul %0, %3, %cst {dimension_numbers = #tpu.dot_dimension_numbers<[1], [0], [0], [1], [0, 0, 1, 1], [], []>} : vector<78x32xf32>, vector<32x256xf32>, vector<78x256xf32> -> vector<78x256xf32>
    %5 = vector.broadcast %1 : vector<78x1xf32> to vector<78x256xf32>
    %6 = arith.addf %4, %5 : vector<78x256xf32>
    %c0_6 = arith.constant 0 : index
    %c0_7 = arith.constant 0 : index
    %c0_8 = arith.constant 0 : index
    %7 = vector.load %arg5[%c0_6, %c0_7, %c0_8] : memref<1x78x256xf32, #tpu.memory_space<vmem>>, vector<1x78x256xf32>
    %8 = vector.shape_cast %7 : vector<1x78x256xf32> to vector<78x256xf32>
    %9 = vector.shape_cast %6 : vector<78x256xf32> to vector<1x78x256xf32>
    tpu.vector_store %arg5[%c0_6, %c0_7, %c0_8], %9 {strides = array<i32>} : memref<1x78x256xf32, #tpu.memory_space<vmem>>, vector<1x78x256xf32>,
    return
  }
  func.func @transform_0(%arg0: i32, %arg1: i32) -> (i32, i32, i32) {
    %c0_i32 = arith.constant 0 : i32
    %c0_i32_0 = arith.constant 0 : i32
    return %arg0, %c0_i32, %arg1 : i32, i32, i32
  }
  func.func @transform_1(%arg0: i32, %arg1: i32) -> (i32, i32) {
    %c0_i32 = arith.constant 0 : i32
    %c0_i32_0 = arith.constant 0 : i32
    %c0_i32_1 = arith.constant 0 : i32
    return %c0_i32, %c0_i32_0 : i32, i32
  }
  func.func @transform_2(%arg0: i32, %arg1: i32) -> (i32, i32) {
    %c0_i32 = arith.constant 0 : i32
    %c0_i32_0 = arith.constant 0 : i32
    %c0_i32_1 = arith.constant 0 : i32
    return %c0_i32, %c0_i32_0 : i32, i32
  }
  func.func @transform_3(%arg0: i32, %arg1: i32) -> (i32, i32, i32) {
    %c0_i32 = arith.constant 0 : i32
    %c0_i32_0 = arith.constant 0 : i32
    return %arg0, %c0_i32, %arg1 : i32, i32, i32
  }
}

</mosaic_0001>

<bundles_post_ra>
// kernel: tpu_custom_call.1
= control target key start
LH: loop header
LB: loop body
LE: loop exit
PB: predicated region body
PF: predicated region fallthrough
CT: control target
= control target key end

     0   :  { %s633_s12 = smov 0   ;;  %s635_s13 = smov 0   ;;  %s772_s0 = inlined_call_operand.vmem [shape: f32[2,32,256], index: 0, kind: input, shape index: {}]   ;;  %s773_s1 = inlined_call_operand.vmem [shape: f32[78,32], index: 1, kind: input, shape index: {}]   ;;  %s774_s2 = inlined_call_operand.vmem [shape: f32[78,1], index: 2, kind: input, shape index: {}]   ;;  %s775_s3 = inlined_call_operand.vmem [shape: f32[2,78,256], index: 3, kind: output, shape index: {}]  }
   0x1   :  { %s637_s14 = smov 0  }
   0x2 LB: > { %s25_s15 = sadd.s32 1, %s606_s13  ;;  %p524_p0 = scmp.ge.s32.totalorder %s610_s14, 1  ;;  %s610_s14 = sphi %s637_s14, %s13_s14   ;;  %s606_s13 = sphi %s635_s13, %s777_s13   ;;  %s602_s12 = sphi %s633_s12, %s776_s12  }
   0x3   : > { %p27_p1 = scmp.ge.s32.totalorder %s25_s15, 2  ;;  %p158_p2 = scmp.lt.s32.totalorder %s610_s14, 3 }
   0x5   : > { %s779_s15 = smov (%p27_p1, %s25_s15), 0  ;;  %p159_p3 = pnand %p524_p0, %p158_p2 }
   0x6   : > { %p191_p4 = scmp.lt.s32.totalorder (!%p159_p3), %s602_s12, 1 }
   0x7   : > { %162 = sbr.rel (%p159_p3) target bundleno = 192 (0xc0), region = 32 }
   0xc   : > { %v220_v0 = vld [vmem:[%s774_s2] sm:$0xff]  ;;  %v612_v1 = vmov 0   ;;  %s781_s12 = smov (!%p191_p4, %s602_s12), 1  ;;  %v222_v2 = vld [vmem:[%s774_s2 + $0x10] sm:$0xff]  ;;  %vm288_vm0 = vcmask 261120   ;;  %v215_v12 = vld [vmem:[%s773_s1 + $0x28] sm:$0xff] }
   0xd   : > { %585 = vset.pattern.permute.xlu0 %v612_v1  ;;  %586 = vset.pattern.permute.xlu1 %v612_v1  ;;  %s550_s20 = sshll.u32 %s781_s12, 6  ;;  %v210_v11 = vld [vmem:[%s773_s1] sm:$0xff]  ;;  %v221_v13 = vld [vmem:[%s774_s2 + $0x8] sm:$0xff]  ;;  %v223_v14 = vld [vmem:[%s774_s2 + $0x18] sm:$0xff]  ;;  %s559_s10 = smul.u32 160, %s781_s12 }
   0xe   : > { %240 = vperm.xlu0 %585, %v220_v0   ;;  %587 = vset.pattern.permute.xlu2 %v612_v1  ;;  %s198_s23 = scalar_lea.vmem %s772_s0, %s550_s20  ;;  %v224_v15 = vld [vmem:[%s774_s2 + $0x20] sm:$0xff]  ;;  %v211_v16 = vld [vmem:[%s773_s1 + $0x8] sm:$0xff]  ;;  %v216_v17 = vld [vmem:[%s773_s1 + $0x30] sm:$0xff] }
   0xf   : > { %250 = vperm.xlu1 %586, %v222_v2   ;;  %v236_v3 = vld [vmem:[%s198_s23 + $0x30] sm:$0xff]  ;;  %v237_v4 = vld [vmem:[%s198_s23 + $0x38] sm:$0xff]  ;;  %v234_v5 = vld [vmem:[%s198_s23 + $0x20] sm:$0xff]  ;;  %260 = vperm.xlu2 %587, %v224_v15   ;;  %s741_s17 = scalar_lea.vmem %s775_s3, %s559_s10 }
  0x10   : > { %331 = vmatpush.msra.mxu0 %v236_v3  ;;  %551 = vmatpush.msra.mxu2 %v236_v3  ;;  %v235_v6 = vld [vmem:[%s198_s23 + $0x28] sm:$0xff]  ;;  %v232_v7 = vld [vmem:[%s198_s23 + $0x10] sm:$0xff]  ;;  %v233_v8 = vld [vmem:[%s198_s23 + $0x18] sm:$0xff] }
  0x11   : > { %378 = vmatpush.msra.mxu1 %v237_v4  ;;  %555 = vmatpush.msra.mxu3 %v237_v4  ;;  %v230_v9 = vld [vmem:[%s198_s23] sm:$0xff]  ;;  %v231_v10 = vld [vmem:[%s198_s23 + $0x8] sm:$0xff]  ;;  %v226_v18 = vld [vmem:[%s774_s2 + $0x30] sm:$0xff] }
  0x12   : > { %332 = vmatpush.msra.mxu0 %v234_v5  ;;  %552 = vmatpush.msra.mxu2 %v234_v5  ;;  %v227_v19 = vld [vmem:[%s774_s2 + $0x38] sm:$0xff]  ;;  %v225_v20 = vld [vmem:[%s774_s2 + $0x28] sm:$0xff]  ;;  %v212_v21 = vld [vmem:[%s773_s1 + $0x10] sm:$0xff] }
  0x13   : > { %379 = vmatpush.msra.mxu1 %v235_v6  ;;  %556 = vmatpush.msra.mxu3 %v235_v6  ;;  %v217_v22 = vld [vmem:[%s773_s1 + $0x38] sm:$0xff]  ;;  %v229_v23 = vld [vmem:[%s774_s2 + $0x48] sm:$0x3f]  ;;  %v228_v24 = vld [vmem:[%s774_s2 + $0x40] sm:$0xff] }
  0x14   : > { %333 = vmatpush.msra.mxu0 %v232_v7  ;;  %553 = vmatpush.msra.mxu2 %v232_v7  ;;  %v213_v25 = vld [vmem:[%s773_s1 + $0x18] sm:$0xff]  ;;  %v218_v26 = vld [vmem:[%s773_s1 + $0x40] sm:$0xff]  ;;  %v219_v28 = vld [vmem:[%s773_s1 + $0x48] sm:$0x3f] }
  0x15   : > { %380 = vmatpush.msra.mxu1 %v233_v8  ;;  %557 = vmatpush.msra.mxu3 %v233_v8  ;;  %v214_v27 = vld [vmem:[%s773_s1 + $0x20] sm:$0xff] }
  0x16   : > { %334 = vmatpush.msra.mxu0 %v230_v9  ;;  %554 = vmatpush.msra.mxu2 %v230_v9 }
  0x17   : > { %381 = vmatpush.msra.mxu1 %v231_v10  ;;  %558 = vmatpush.msra.mxu3 %v231_v10 }
  0x18   : > { %528 = vmatmul.msk.f32.vlgmr.msra.gmra.mxu0 %vm288_vm0, %v210_v11  ;;  %533 = vmatmul.msk.f32.vlgmr.msra.gmra.mxu2 %vm288_vm0, %v215_v12 }
  0x19   : > { %538 = vmatmul.msk.f32.vlgmr.msra.gmra.mxu1 %vm288_vm0, %v210_v11  ;;  %543 = vmatmul.msk.f32.vlgmr.msra.gmra.mxu3 %vm288_vm0, %v215_v12 }
  0x1a   : > { %245 = vperm.xlu0 %585, %v221_v13   ;;  %255 = vperm.xlu1 %586, %v223_v14  }
  0x1b   : > { %265 = vperm.xlu2 %587, %v225_v20  }
  0x20   : > { %529 = vmatmul.msk.f32.gmra.mxu0 %vm288_vm0, %v211_v16  ;;  %534 = vmatmul.msk.f32.gmra.mxu2 %vm288_vm0, %v216_v17 }
  0x21   : > { %539 = vmatmul.msk.f32.gmra.mxu1 %vm288_vm0, %v211_v16  ;;  %544 = vmatmul.msk.f32.gmra.mxu3 %vm288_vm0, %v216_v17 }
  0x22   : > { %270 = vperm.xlu0 %585, %v226_v18   ;;  %275 = vperm.xlu1 %586, %v227_v19  }
  0x23   : > { %280 = vperm.xlu2 %587, %v228_v24  }
  0x28   : > { %530 = vmatmul.msk.f32.gmra.mxu0 %vm288_vm0, %v212_v21  ;;  %535 = vmatmul.msk.f32.gmra.mxu2 %vm288_vm0, %v217_v22 }
  0x29   : > { %540 = vmatmul.msk.f32.gmra.mxu1 %vm288_vm0, %v212_v21  ;;  %545 = vmatmul.msk.f32.gmra.mxu3 %vm288_vm0, %v217_v22 }
  0x2a   : > { %285 = vperm.xlu0 %585, %v229_v23  }
  0x30   : > { %531 = vmatmul.msk.f32.gmra.mxu0 %vm288_vm0, %v213_v25  ;;  %536 = vmatmul.msk.f32.gmra.mxu2 %vm288_vm0, %v218_v26 }
  0x31   : > { %541 = vmatmul.msk.f32.gmra.mxu1 %vm288_vm0, %v213_v25  ;;  %546 = vmatmul.msk.f32.gmra.mxu3 %vm288_vm0, %v218_v26 }
  0x38   : > { %532 = vmatmul.msk.f32.gmra.mxu0 %vm288_vm0, %v214_v27  ;;  %537 = vmatmul.msk.f32.gmra.mxu2 %vm288_vm0, %v219_v28 }
  0x39   : > { %542 = vmatmul.msk.f32.gmra.mxu1 %vm288_vm0, %v214_v27  ;;  %547 = vmatmul.msk.f32.gmra.mxu3 %vm288_vm0, %v219_v28 }
  0x69   : > { %v261_v30 = vpop.permute.xlu2 %260 }
  0x75   : > { %v266_v37 = vpop.permute.xlu2 %265 }
  0x7d   : > { %v281_v1 = vpop.permute.xlu2 %280 }
  0x80   : > { %v241_v29 = vpop.permute.xlu0 %240 }
  0x81   : > { %v251_v32 = vpop.permute.xlu1 %250 }
  0x8c   : > { %v246_v36 = vpop.permute.xlu0 %245  ;;  %v256_v46 = vpop.permute.xlu1 %255 }
  0x94   : > { %v271_v47 = vpop.permute.xlu0 %270  ;;  %v276_v56 = vpop.permute.xlu1 %275 }
  0x95   : > { %v336_v31 = vpop.f32.mrf.mxu0 }
  0x96   : > { %v337_v33 = vadd.f32 %v336_v31, %v241_v29  ;;  %v383_v34 = vpop.f32.mrf.mxu1 }
  0x97   : > { %v384_v35 = vadd.f32 %v383_v34, %v241_v29 }
  0x98   : > { %413 = vst [vmem:[%s741_s17] sm:$0xff] %v337_v33 }
  0x99   : > { %414 = vst [vmem:[%s741_s17 + $0x8] sm:$0xff] %v384_v35 }
  0x9b   : > { %v351_v38 = vpop.f32.mrf.mxu2 }
  0x9c   : > { %v352_v39 = vadd.f32 %v351_v38, %v266_v37  ;;  %v398_v40 = vpop.f32.mrf.mxu3  ;;  %v286_v10 = vpop.permute.xlu0 %285 }
  0x9d   : > { %v399_v41 = vadd.f32 %v398_v40, %v266_v37  ;;  %v339_v42 = vpop.f32.mrf.mxu0 }
  0x9e   : > { %423 = vst [vmem:[%s741_s17 + $0x50] sm:$0xff] %v352_v39  ;;  %v340_v43 = vadd.f32 %v339_v42, %v246_v36  ;;  %v386_v44 = vpop.f32.mrf.mxu1 }
  0x9f   : > { %424 = vst [vmem:[%s741_s17 + $0x58] sm:$0xff] %v399_v41  ;;  %v387_v45 = vadd.f32 %v386_v44, %v246_v36 }
  0xa0   : > { %415 = vst [vmem:[%s741_s17 + $0x10] sm:$0xff] %v340_v43 }
  0xa1   : > { %416 = vst [vmem:[%s741_s17 + $0x18] sm:$0xff] %v387_v45 }
  0xa3   : > { %v354_v48 = vpop.f32.mrf.mxu2 }
  0xa4   : > { %v355_v49 = vadd.f32 %v354_v48, %v271_v47  ;;  %v401_v50 = vpop.f32.mrf.mxu3 }
  0xa5   : > { %v402_v51 = vadd.f32 %v401_v50, %v271_v47  ;;  %v342_v52 = vpop.f32.mrf.mxu0 }
  0xa6   : > { %425 = vst [vmem:[%s741_s17 + $0x60] sm:$0xff] %v355_v49  ;;  %v343_v53 = vadd.f32 %v342_v52, %v251_v32  ;;  %v389_v54 = vpop.f32.mrf.mxu1 }
  0xa7   : > { %426 = vst [vmem:[%s741_s17 + $0x68] sm:$0xff] %v402_v51  ;;  %v390_v55 = vadd.f32 %v389_v54, %v251_v32 }
  0xa8   : > { %417 = vst [vmem:[%s741_s17 + $0x20] sm:$0xff] %v343_v53 }
  0xa9   : > { %418 = vst [vmem:[%s741_s17 + $0x28] sm:$0xff] %v390_v55 }
  0xab   : > { %v357_v57 = vpop.f32.mrf.mxu2 }
  0xac   : > { %v358_v58 = vadd.f32 %v357_v57, %v276_v56  ;;  %v404_v59 = vpop.f32.mrf.mxu3 }
  0xad   : > { %v405_v60 = vadd.f32 %v404_v59, %v276_v56  ;;  %v345_v61 = vpop.f32.mrf.mxu0 }
  0xae   : > { %427 = vst [vmem:[%s741_s17 + $0x70] sm:$0xff] %v358_v58  ;;  %v346_v62 = vadd.f32 %v345_v61, %v256_v46  ;;  %v392_v63 = vpop.f32.mrf.mxu1 }
  0xaf   : > { %428 = vst [vmem:[%s741_s17 + $0x78] sm:$0xff] %v405_v60  ;;  %v393_v0 = vadd.f32 %v392_v63, %v256_v46 }
  0xb0   : > { %419 = vst [vmem:[%s741_s17 + $0x30] sm:$0xff] %v346_v62 }
  0xb1   : > { %420 = vst [vmem:[%s741_s17 + $0x38] sm:$0xff] %v393_v0 }
  0xb3   : > { %v360_v2 = vpop.f32.mrf.mxu2 }
  0xb4   : > { %v361_v3 = vadd.f32 %v360_v2, %v281_v1  ;;  %v407_v4 = vpop.f32.mrf.mxu3 }
  0xb5   : > { %v408_v5 = vadd.f32 %v407_v4, %v281_v1  ;;  %v348_v6 = vpop.f32.mrf.mxu0 }
  0xb6   : > { %429 = vst [vmem:[%s741_s17 + $0x80] sm:$0xff] %v361_v3  ;;  %v349_v7 = vadd.f32 %v348_v6, %v261_v30  ;;  %v395_v8 = vpop.f32.mrf.mxu1 }
  0xb7   : > { %430 = vst [vmem:[%s741_s17 + $0x88] sm:$0xff] %v408_v5  ;;  %v396_v9 = vadd.f32 %v395_v8, %v261_v30 }
  0xb8   : > { %421 = vst [vmem:[%s741_s17 + $0x40] sm:$0xff] %v349_v7 }
  0xb9   : > { %422 = vst [vmem:[%s741_s17 + $0x48] sm:$0xff] %v396_v9 }
  0xbb   : > { %v363_v11 = vpop.f32.mrf.mxu2 }
  0xbc   : > { %v364_v12 = vadd.f32 %v363_v11, %v286_v10  ;;  %v410_v13 = vpop.f32.mrf.mxu3 }
  0xbd   : > { %v411_v14 = vadd.f32 %v410_v13, %v286_v10 }
  0xbe   : > { %431 = vst [vmem:[%s741_s17 + $0x90] sm:$0x3f] %v364_v12 }
  0xbf   : > { %432 = vst [vmem:[%s741_s17 + $0x98] sm:$0x3f] %v411_v14 }
  0xc0 PF: > { %s13_s14 = sadd.s32 1, %s610_s14   ;;  %s776_s12 = smov %s606_s13 }
  0xc1   : > { %p10_p5 = scmp.ge.s32.totalorder %s13_s14, 4   ;;  %s777_s13 = smov %s779_s15 }
  0xc3   :  { %12 = sbr.rel (!%p10_p5) target bundleno = 2 (0x2), region = 62 }

</bundles_post_ra>
